<compile_context>
chip_gen: v6e
topology: v6e:2x2x1
jax: 0.10.0
libtpu: 0.0.40
codegen_flags: <defaults>
</compile_context>

<pallas_src>
import functools

import jax
import jax.numpy as jnp
from jax.experimental import pallas as pl
from jax.experimental.pallas import tpu as pltpu


def angle_noise_kernel(no_blocks,
                       s_ref, si_ref,            # [TM, F] f32 each
                       w_in_ref, w_init_ref,     # [F, H] bf16 each
                       b_in_ref,                 # [1, H]  f32 (b_in + b_initial)
                       wb_ref, bb_ref,           # [2*nb, H, H] bf16, [2*nb, 1, H] f32
                       w_out_ref, b_out_ref,     # [H, A] bf16, [1, A] f32
                       out_ref):                 # [TM, A] f32
    # relu in f32 (v5e-safe), cast to bf16 just before each MXU push.
    s = jnp.maximum(s_ref[...], 0.0).astype(jnp.bfloat16)
    si = jnp.maximum(si_ref[...], 0.0).astype(jnp.bfloat16)
    a = (jnp.dot(s, w_in_ref[...], preferred_element_type=jnp.float32)
         + jnp.dot(si, w_init_ref[...], preferred_element_type=jnp.float32)
         + b_in_ref[...])

    # AngleResnetBlock x no_blocks (static unroll); residual accumulator in f32.
    for k in range(no_blocks):
        h = jnp.maximum(a, 0.0).astype(jnp.bfloat16)
        h = jnp.dot(h, wb_ref[2 * k],
                    preferred_element_type=jnp.float32) + bb_ref[2 * k]
        h = jnp.maximum(h, 0.0).astype(jnp.bfloat16)
        h = jnp.dot(h, wb_ref[2 * k + 1],
                    preferred_element_type=jnp.float32) + bb_ref[2 * k + 1]
        a = a + h

    # linear_out(relu(a)) -> [TM, no_angles]; no lane padding so HBM writeback
    # carries only useful bytes.
    h = jnp.maximum(a, 0.0).astype(jnp.bfloat16)
    out = jnp.dot(h, w_out_ref[...], preferred_element_type=jnp.float32) + b_out_ref[...]
    out_ref[...] = out.astype(out_ref.dtype)


def _num_tensorcores():
    """Best-effort TensorCore count of the local device (1 if unknown)."""
    try:
        d = jax.devices()[0]
        for attr in ("num_cores", "core_count"):
            v = getattr(d, attr, None)
            if isinstance(v, int) and v > 0:
                return v
    except Exception:
        pass
    return 1


def _choose_tile_m(m_rows, requested, num_cores=1):
    """Big row tile to amortize the ~0.35us per-grid-step overhead; only on
    multi-TC parts (v7x) shrink so each core keeps >=2 steps (double-buffered
    DMA per core).  Always a multiple of 8 (sublane)."""
    m8 = ((m_rows + 7) // 8) * 8
    tm = max(8, min((requested // 8) * 8, m8))
    if num_cores > 1:
        while tm > 8 and pl.cdiv(m8, tm) < 2 * num_cores:
            tm = max(8, ((tm // 2) // 8) * 8)
    return tm


def prepare_params(params):
    """One-time packing of module parameters for the kernel (hoisted out of the
    per-call forward): bf16 casts for MXU operands, fused input biases, and the
    per-block weights/biases stacked into single arrays."""
    (w_in, b_in, w_init, b_init, w1, b1, w2, b2, w_out, b_out) = params
    no_blocks, H, _ = w1.shape
    w_in_p = w_in.astype(jnp.bfloat16)                                     # [F, H]
    w_init_p = w_init.astype(jnp.bfloat16)                                 # [F, H]
    b_in_p = (b_in + b_init).astype(jnp.float32).reshape(1, H)             # [1, H]
    wb = jnp.stack([w1, w2], axis=1).reshape(2 * no_blocks, H, H).astype(jnp.bfloat16)
    bb = jnp.stack([b1, b2], axis=1).reshape(2 * no_blocks, 1, H).astype(jnp.float32)
    w_out_p = w_out.astype(jnp.bfloat16)                                   # [H, A]
    b_out_p = b_out.astype(jnp.float32).reshape(1, -1)                     # [1, A]
    return (w_in_p, w_init_p, b_in_p, wb, bb, w_out_p, b_out_p)


def angle_noise_forward(s, s_initial, packed_params, *, no_rigids, no_blocks,
                        tile_m=1024):
    """s, s_initial: [B, N_rigid, c_in]  ->  [B, N_res, no_angles]."""
    B, n_rigid, c_in = s.shape
    assert n_rigid % no_rigids == 0
    n_res = n_rigid // no_rigids
    F = c_in * no_rigids
    M = B * n_res

    (w_in_p, w_init_p, b_in_p, wb, bb, w_out_p, b_out_p) = packed_params
    H = w_in_p.shape[1]
    A = w_out_p.shape[1]
    nb2 = wb.shape[0]
    assert nb2 == 2 * no_blocks and w_in_p.shape[0] == F

    # reshape exactly like the torch module, then flatten rows (free, contiguous)
    s_flat = s.reshape(M, F)
    si_flat = s_initial.reshape(M, F)

    # ---- row tiling (pad only the tail when TM doesn't divide M) ----
    tm = _choose_tile_m(M, tile_m, _num_tensorcores())
    M_pad = pl.cdiv(M, tm) * tm
    if M_pad != M:
        s_flat = jnp.pad(s_flat, ((0, M_pad - M), (0, 0)))
        si_flat = jnp.pad(si_flat, ((0, M_pad - M), (0, 0)))
    grid = (M_pad // tm,)

    row_spec = pl.BlockSpec((tm, F), lambda i: (i, 0))
    out_spec = pl.BlockSpec((tm, A), lambda i: (i, 0))
    full = lambda shape: pl.BlockSpec(shape, lambda i: (0,) * len(shape))

    out = pl.pallas_call(
        functools.partial(angle_noise_kernel, no_blocks),
        out_shape=jax.ShapeDtypeStruct((M_pad, A), s.dtype),
        grid_spec=pltpu.PrefetchScalarGridSpec(
            num_scalar_prefetch=0,
            grid=grid,
            in_specs=[
                row_spec, row_spec,                      # s rows, s_initial rows
                full((F, H)), full((F, H)), full((1, H)),  # linear_in / linear_initial
                full((nb2, H, H)), full((nb2, 1, H)),    # packed resnet blocks
                full((H, A)), full((1, A)),              # linear_out
            ],
            out_specs=out_spec,
        ),
        compiler_params=pltpu.CompilerParams(
            dimension_semantics=("parallel",)),
    )(s_flat, si_flat, w_in_p, w_init_p, b_in_p, wb, bb, w_out_p, b_out_p)

    if M_pad != M:
        out = out[:M]
    return out.reshape(B, n_res, A)


def reference_forward(s, s_initial, params, *, no_rigids, no_blocks,
                      matmul_dtype=jnp.float32):
    """Pure-JAX reference matching the torch forward.  matmul_dtype=bf16
    mirrors the kernel's MXU precision (f32 accumulation either way)."""
    (w_in, b_in, w_init, b_init, w1, b1, w2, b2, w_out, b_out) = params
    B, n_rigid, c_in = s.shape
    F = c_in * no_rigids
    s2 = s.reshape(B, -1, F)
    si2 = s_initial.reshape(B, -1, F)

    def mm(lhs, w):
        return jnp.dot(lhs.astype(matmul_dtype), w.astype(matmul_dtype),
                       preferred_element_type=jnp.float32)

    a = mm(jax.nn.relu(s2), w_in) + b_in[0]
    a = a + mm(jax.nn.relu(si2), w_init) + b_init[0]
    for k in range(no_blocks):
        h = jax.nn.relu(a)
        h = mm(h, w1[k]) + b1[k, 0]
        h = jax.nn.relu(h)
        h = mm(h, w2[k]) + b2[k, 0]
        a = a + h
    a = jax.nn.relu(a)
    return mm(a, w_out) + b_out[0]


def init_params(key, c_in, c_hidden, no_blocks, no_angles, no_rigids):
    F = c_in * no_rigids
    ks = jax.random.split(key, 10)
    std = 0.1
    w_in = std * jax.random.normal(ks[0], (F, c_hidden), jnp.float32)
    b_in = std * jax.random.normal(ks[1], (1, c_hidden), jnp.float32)
    w_init = std * jax.random.normal(ks[2], (F, c_hidden), jnp.float32)
    b_init = std * jax.random.normal(ks[3], (1, c_hidden), jnp.float32)
    w1 = std * jax.random.normal(ks[4], (no_blocks, c_hidden, c_hidden), jnp.float32)
    b1 = std * jax.random.normal(ks[5], (no_blocks, 1, c_hidden), jnp.float32)
    w2 = std * jax.random.normal(ks[6], (no_blocks, c_hidden, c_hidden), jnp.float32)
    b2 = std * jax.random.normal(ks[7], (no_blocks, 1, c_hidden), jnp.float32)
    w_out = std * jax.random.normal(ks[8], (c_hidden, no_angles), jnp.float32)
    b_out = std * jax.random.normal(ks[9], (1, no_angles), jnp.float32)
    return (w_in, b_in, w_init, b_init, w1, b1, w2, b2, w_out, b_out)


if __name__ == "__main__":
    # Module hyperparameters (small, consistent with the forward pass)
    c_in = 8
    no_rigids = 4
    c_hidden = 32
    no_blocks = 2
    no_angles = 8
    epsilon = 1e-8  # declared by the torch module but unused in its forward

    B = 2
    n_res = 4
    n_rigid = n_res * no_rigids  # 16

    key = jax.random.PRNGKey(0)
    k_s, k_si, k_p = jax.random.split(key, 3)
    s = jax.random.normal(k_s, (B, n_rigid, c_in), jnp.float32)
    s_initial = jax.random.normal(k_si, (B, n_rigid, c_in), jnp.float32)

    params = init_params(k_p, c_in, c_hidden, no_blocks, no_angles, no_rigids)
    packed = prepare_params(params)   # one-time packing, hoisted out of forward

    forward = jax.jit(functools.partial(
        angle_noise_forward, no_rigids=no_rigids, no_blocks=no_blocks, tile_m=1024))

    out = forward(s, s_initial, packed)
    out = jax.block_until_ready(out)
    assert out.shape == (B, n_res, no_angles)

    # Tight check vs a reference using the same bf16 MXU precision.
    ref_bf16 = reference_forward(s, s_initial, params, no_rigids=no_rigids,
                                 no_blocks=no_blocks, matmul_dtype=jnp.bfloat16)
    assert jnp.allclose(out, ref_bf16, atol=2e-3, rtol=2e-3), "mismatch vs bf16 reference"

    # Loose check vs the full-f32 reference (bounds bf16 MXU rounding error).
    ref_f32 = reference_forward(s, s_initial, params, no_rigids=no_rigids,
                                no_blocks=no_blocks, matmul_dtype=jnp.float32)
    assert jnp.allclose(out, ref_f32, atol=5e-2, rtol=5e-2), "mismatch vs f32 reference"

    print("KERNEL_OK")
</pallas_src>

<mosaic_0001>
module attributes {stable_mosaic.version = 11 : i64} {
  func.func @angle_noise_kernel(%arg0: i32, %arg1: memref<8x32xf32, #tpu.memory_space<vmem>>, %arg2: memref<8x32xf32, #tpu.memory_space<vmem>>, %arg3: memref<32x32xbf16, #tpu.memory_space<vmem>>, %arg4: memref<32x32xbf16, #tpu.memory_space<vmem>>, %arg5: memref<1x32xf32, #tpu.memory_space<vmem>>, %arg6: memref<4x32x32xbf16, #tpu.memory_space<vmem>>, %arg7: memref<4x1x32xf32, #tpu.memory_space<vmem>>, %arg8: memref<32x8xbf16, #tpu.memory_space<vmem>>, %arg9: memref<1x8xf32, #tpu.memory_space<vmem>>, %arg10: memref<8x8xf32, #tpu.memory_space<vmem>>) attributes {dimension_semantics = [#tpu.dimension_semantics<parallel>], iteration_bounds = array<i64: 1>, scalar_prefetch = 0 : i64, scratch_operands = 0 : i64, tpu.core_type = #tpu.core_type<tc>, window_params = [{transform_indices = @transform_0, window_bounds = array<i64: 8, 32>}, {transform_indices = @transform_1, window_bounds = array<i64: 8, 32>}, {pipeline_mode = #tpu.pipeline_mode<synchronous>, transform_indices = @transform_2, window_bounds = array<i64: 32, 32>}, {pipeline_mode = #tpu.pipeline_mode<synchronous>, transform_indices = @transform_3, window_bounds = array<i64: 32, 32>}, {pipeline_mode = #tpu.pipeline_mode<synchronous>, transform_indices = @transform_4, window_bounds = array<i64: 1, 32>}, {pipeline_mode = #tpu.pipeline_mode<synchronous>, transform_indices = @transform_5, window_bounds = array<i64: 4, 32, 32>}, {pipeline_mode = #tpu.pipeline_mode<synchronous>, transform_indices = @transform_6, window_bounds = array<i64: 4, 1, 32>}, {pipeline_mode = #tpu.pipeline_mode<synchronous>, transform_indices = @transform_7, window_bounds = array<i64: 32, 8>}, {pipeline_mode = #tpu.pipeline_mode<synchronous>, transform_indices = @transform_8, window_bounds = array<i64: 1, 8>}, {transform_indices = @transform_9, window_bounds = array<i64: 8, 8>}]} {
    %c0 = arith.constant 0 : index
    %c0_0 = arith.constant 0 : index
    %0 = vector.load %arg1[%c0, %c0_0] : memref<8x32xf32, #tpu.memory_space<vmem>>, vector<8x32xf32>
    %cst = arith.constant 0.000000e+00 : f32
    %1 = vector.broadcast %cst : f32 to vector<8x32xf32>
    %2 = arith.maximumf %0, %1 : vector<8x32xf32>
    %3 = arith.truncf %2 : vector<8x32xf32> to vector<8x32xbf16>
    %c0_1 = arith.constant 0 : index
    %c0_2 = arith.constant 0 : index
    %4 = vector.load %arg2[%c0_1, %c0_2] : memref<8x32xf32, #tpu.memory_space<vmem>>, vector<8x32xf32>
    %cst_3 = arith.constant 0.000000e+00 : f32
    %5 = vector.broadcast %cst_3 : f32 to vector<8x32xf32>
    %6 = arith.maximumf %4, %5 : vector<8x32xf32>
    %7 = arith.truncf %6 : vector<8x32xf32> to vector<8x32xbf16>
    %c0_4 = arith.constant 0 : index
    %c0_5 = arith.constant 0 : index
    %8 = vector.load %arg3[%c0_4, %c0_5] : memref<32x32xbf16, #tpu.memory_space<vmem>>, vector<32x32xbf16>
    %cst_6 = arith.constant dense<0.000000e+00> : vector<8x32xf32>
    %9 = tpu.matmul %3, %8, %cst_6 {dimension_numbers = #tpu.dot_dimension_numbers<[1], [0], [0], [1], [0, 0, 1, 1], [], []>} : vector<8x32xbf16>, vector<32x32xbf16>, vector<8x32xf32> -> vector<8x32xf32>
    %c0_7 = arith.constant 0 : index
    %c0_8 = arith.constant 0 : index
    %10 = vector.load %arg4[%c0_7, %c0_8] : memref<32x32xbf16, #tpu.memory_space<vmem>>, vector<32x32xbf16>
    %cst_9 = arith.constant dense<0.000000e+00> : vector<8x32xf32>
    %11 = tpu.matmul %7, %10, %cst_9 {dimension_numbers = #tpu.dot_dimension_numbers<[1], [0], [0], [1], [0, 0, 1, 1], [], []>} : vector<8x32xbf16>, vector<32x32xbf16>, vector<8x32xf32> -> vector<8x32xf32>
    %12 = arith.addf %9, %11 : vector<8x32xf32>
    %c0_10 = arith.constant 0 : index
    %c0_11 = arith.constant 0 : index
    %13 = vector.load %arg5[%c0_10, %c0_11] : memref<1x32xf32, #tpu.memory_space<vmem>>, vector<1x32xf32>
    %14 = vector.broadcast %13 : vector<1x32xf32> to vector<8x32xf32>
    %15 = arith.addf %12, %14 : vector<8x32xf32>
    %cst_12 = arith.constant 0.000000e+00 : f32
    %16 = vector.broadcast %cst_12 : f32 to vector<8x32xf32>
    %17 = arith.maximumf %15, %16 : vector<8x32xf32>
    %18 = arith.truncf %17 : vector<8x32xf32> to vector<8x32xbf16>
    %c0_13 = arith.constant 0 : index
    %c0_14 = arith.constant 0 : index
    %c0_15 = arith.constant 0 : index
    %19 = vector.load %arg6[%c0_13, %c0_14, %c0_15] : memref<4x32x32xbf16, #tpu.memory_space<vmem>>, vector<1x32x32xbf16>
    %20 = vector.shape_cast %19 : vector<1x32x32xbf16> to vector<32x32xbf16>
    %cst_16 = arith.constant dense<0.000000e+00> : vector<8x32xf32>
    %21 = tpu.matmul %18, %20, %cst_16 {dimension_numbers = #tpu.dot_dimension_numbers<[1], [0], [0], [1], [0, 0, 1, 1], [], []>} : vector<8x32xbf16>, vector<32x32xbf16>, vector<8x32xf32> -> vector<8x32xf32>
    %c0_17 = arith.constant 0 : index
    %c0_18 = arith.constant 0 : index
    %c0_19 = arith.constant 0 : index
    %22 = vector.load %arg7[%c0_17, %c0_18, %c0_19] : memref<4x1x32xf32, #tpu.memory_space<vmem>>, vector<1x1x32xf32>
    %23 = vector.shape_cast %22 : vector<1x1x32xf32> to vector<1x32xf32>
    %24 = vector.broadcast %23 : vector<1x32xf32> to vector<8x32xf32>
    %25 = arith.addf %21, %24 : vector<8x32xf32>
    %cst_20 = arith.constant 0.000000e+00 : f32
    %26 = vector.broadcast %cst_20 : f32 to vector<8x32xf32>
    %27 = arith.maximumf %25, %26 : vector<8x32xf32>
    %28 = arith.truncf %27 : vector<8x32xf32> to vector<8x32xbf16>
    %c1 = arith.constant 1 : index
    %c0_21 = arith.constant 0 : index
    %c0_22 = arith.constant 0 : index
    %29 = vector.load %arg6[%c1, %c0_21, %c0_22] : memref<4x32x32xbf16, #tpu.memory_space<vmem>>, vector<1x32x32xbf16>
    %30 = vector.shape_cast %29 : vector<1x32x32xbf16> to vector<32x32xbf16>
    %cst_23 = arith.constant dense<0.000000e+00> : vector<8x32xf32>
    %31 = tpu.matmul %28, %30, %cst_23 {dimension_numbers = #tpu.dot_dimension_numbers<[1], [0], [0], [1], [0, 0, 1, 1], [], []>} : vector<8x32xbf16>, vector<32x32xbf16>, vector<8x32xf32> -> vector<8x32xf32>
    %c1_24 = arith.constant 1 : index
    %c0_25 = arith.constant 0 : index
    %c0_26 = arith.constant 0 : index
    %32 = vector.load %arg7[%c1_24, %c0_25, %c0_26] : memref<4x1x32xf32, #tpu.memory_space<vmem>>, vector<1x1x32xf32>
    %33 = vector.shape_cast %32 : vector<1x1x32xf32> to vector<1x32xf32>
    %34 = vector.broadcast %33 : vector<1x32xf32> to vector<8x32xf32>
    %35 = arith.addf %31, %34 : vector<8x32xf32>
    %36 = arith.addf %15, %35 : vector<8x32xf32>
    %cst_27 = arith.constant 0.000000e+00 : f32
    %37 = vector.broadcast %cst_27 : f32 to vector<8x32xf32>
    %38 = arith.maximumf %36, %37 : vector<8x32xf32>
    %39 = arith.truncf %38 : vector<8x32xf32> to vector<8x32xbf16>
    %c2 = arith.constant 2 : index
    %c0_28 = arith.constant 0 : index
    %c0_29 = arith.constant 0 : index
    %40 = vector.load %arg6[%c2, %c0_28, %c0_29] : memref<4x32x32xbf16, #tpu.memory_space<vmem>>, vector<1x32x32xbf16>
    %41 = vector.shape_cast %40 : vector<1x32x32xbf16> to vector<32x32xbf16>
    %cst_30 = arith.constant dense<0.000000e+00> : vector<8x32xf32>
    %42 = tpu.matmul %39, %41, %cst_30 {dimension_numbers = #tpu.dot_dimension_numbers<[1], [0], [0], [1], [0, 0, 1, 1], [], []>} : vector<8x32xbf16>, vector<32x32xbf16>, vector<8x32xf32> -> vector<8x32xf32>
    %c2_31 = arith.constant 2 : index
    %c0_32 = arith.constant 0 : index
    %c0_33 = arith.constant 0 : index
    %43 = vector.load %arg7[%c2_31, %c0_32, %c0_33] : memref<4x1x32xf32, #tpu.memory_space<vmem>>, vector<1x1x32xf32>
    %44 = vector.shape_cast %43 : vector<1x1x32xf32> to vector<1x32xf32>
    %45 = vector.broadcast %44 : vector<1x32xf32> to vector<8x32xf32>
    %46 = arith.addf %42, %45 : vector<8x32xf32>
    %cst_34 = arith.constant 0.000000e+00 : f32
    %47 = vector.broadcast %cst_34 : f32 to vector<8x32xf32>
    %48 = arith.maximumf %46, %47 : vector<8x32xf32>
    %49 = arith.truncf %48 : vector<8x32xf32> to vector<8x32xbf16>
    %c3 = arith.constant 3 : index
    %c0_35 = arith.constant 0 : index
    %c0_36 = arith.constant 0 : index
    %50 = vector.load %arg6[%c3, %c0_35, %c0_36] : memref<4x32x32xbf16, #tpu.memory_space<vmem>>, vector<1x32x32xbf16>
    %51 = vector.shape_cast %50 : vector<1x32x32xbf16> to vector<32x32xbf16>
    %cst_37 = arith.constant dense<0.000000e+00> : vector<8x32xf32>
    %52 = tpu.matmul %49, %51, %cst_37 {dimension_numbers = #tpu.dot_dimension_numbers<[1], [0], [0], [1], [0, 0, 1, 1], [], []>} : vector<8x32xbf16>, vector<32x32xbf16>, vector<8x32xf32> -> vector<8x32xf32>
    %c3_38 = arith.constant 3 : index
    %c0_39 = arith.constant 0 : index
    %c0_40 = arith.constant 0 : index
    %53 = vector.load %arg7[%c3_38, %c0_39, %c0_40] : memref<4x1x32xf32, #tpu.memory_space<vmem>>, vector<1x1x32xf32>
    %54 = vector.shape_cast %53 : vector<1x1x32xf32> to vector<1x32xf32>
    %55 = vector.broadcast %54 : vector<1x32xf32> to vector<8x32xf32>
    %56 = arith.addf %52, %55 : vector<8x32xf32>
    %57 = arith.addf %36, %56 : vector<8x32xf32>
    %cst_41 = arith.constant 0.000000e+00 : f32
    %58 = vector.broadcast %cst_41 : f32 to vector<8x32xf32>
    %59 = arith.maximumf %57, %58 : vector<8x32xf32>
    %60 = arith.truncf %59 : vector<8x32xf32> to vector<8x32xbf16>
    %c0_42 = arith.constant 0 : index
    %c0_43 = arith.constant 0 : index
    %61 = vector.load %arg8[%c0_42, %c0_43] : memref<32x8xbf16, #tpu.memory_space<vmem>>, vector<32x8xbf16>
    %cst_44 = arith.constant dense<0.000000e+00> : vector<8x8xf32>
    %62 = tpu.matmul %60, %61, %cst_44 {dimension_numbers = #tpu.dot_dimension_numbers<[1], [0], [0], [1], [0, 0, 1, 1], [], []>} : vector<8x32xbf16>, vector<32x8xbf16>, vector<8x8xf32> -> vector<8x8xf32>
    %c0_45 = arith.constant 0 : index
    %c0_46 = arith.constant 0 : index
    %63 = vector.load %arg9[%c0_45, %c0_46] : memref<1x8xf32, #tpu.memory_space<vmem>>, vector<1x8xf32>
    %64 = vector.broadcast %63 : vector<1x8xf32> to vector<8x8xf32>
    %65 = arith.addf %62, %64 : vector<8x8xf32>
    %c0_47 = arith.constant 0 : index
    %c0_48 = arith.constant 0 : index
    %66 = vector.load %arg10[%c0_47, %c0_48] : memref<8x8xf32, #tpu.memory_space<vmem>>, vector<8x8xf32>
    tpu.vector_store %arg10[%c0_47, %c0_48], %65 {strides = array<i32>} : memref<8x8xf32, #tpu.memory_space<vmem>>, vector<8x8xf32>,
    return
  }
  func.func @transform_0(%arg0: i32) -> (i32, i32) {
    %c0_i32 = arith.constant 0 : i32
    %c0_i32_0 = arith.constant 0 : i32
    return %arg0, %c0_i32 : i32, i32
  }
  func.func @transform_1(%arg0: i32) -> (i32, i32) {
    %c0_i32 = arith.constant 0 : i32
    %c0_i32_0 = arith.constant 0 : i32
    return %arg0, %c0_i32 : i32, i32
  }
  func.func @transform_2(%arg0: i32) -> (i32, i32) {
    %c0_i32 = arith.constant 0 : i32
    %c0_i32_0 = arith.constant 0 : i32
    %c0_i32_1 = arith.constant 0 : i32
    return %c0_i32, %c0_i32_0 : i32, i32
  }
  func.func @transform_3(%arg0: i32) -> (i32, i32) {
    %c0_i32 = arith.constant 0 : i32
    %c0_i32_0 = arith.constant 0 : i32
    %c0_i32_1 = arith.constant 0 : i32
    return %c0_i32, %c0_i32_0 : i32, i32
  }
  func.func @transform_4(%arg0: i32) -> (i32, i32) {
    %c0_i32 = arith.constant 0 : i32
    %c0_i32_0 = arith.constant 0 : i32
    %c0_i32_1 = arith.constant 0 : i32
    return %c0_i32, %c0_i32_0 : i32, i32
  }
  func.func @transform_5(%arg0: i32) -> (i32, i32, i32) {
    %c0_i32 = arith.constant 0 : i32
    %c0_i32_0 = arith.constant 0 : i32
    %c0_i32_1 = arith.constant 0 : i32
    %c0_i32_2 = arith.constant 0 : i32
    return %c0_i32, %c0_i32_0, %c0_i32_1 : i32, i32, i32
  }
  func.func @transform_6(%arg0: i32) -> (i32, i32, i32) {
    %c0_i32 = arith.constant 0 : i32
    %c0_i32_0 = arith.constant 0 : i32
    %c0_i32_1 = arith.constant 0 : i32
    %c0_i32_2 = arith.constant 0 : i32
    return %c0_i32, %c0_i32_0, %c0_i32_1 : i32, i32, i32
  }
  func.func @transform_7(%arg0: i32) -> (i32, i32) {
    %c0_i32 = arith.constant 0 : i32
    %c0_i32_0 = arith.constant 0 : i32
    %c0_i32_1 = arith.constant 0 : i32
    return %c0_i32, %c0_i32_0 : i32, i32
  }
  func.func @transform_8(%arg0: i32) -> (i32, i32) {
    %c0_i32 = arith.constant 0 : i32
    %c0_i32_0 = arith.constant 0 : i32
    %c0_i32_1 = arith.constant 0 : i32
    return %c0_i32, %c0_i32_0 : i32, i32
  }
  func.func @transform_9(%arg0: i32) -> (i32, i32) {
    %c0_i32 = arith.constant 0 : i32
    %c0_i32_0 = arith.constant 0 : i32
    return %arg0, %c0_i32 : i32, i32
  }
}

</mosaic_0001>

<bundles_post_ra>
// kernel: angle_noise_forward.1
= control target key start
LH: loop header
LB: loop body
LE: loop exit
PB: predicated region body
PF: predicated region fallthrough
CT: control target
= control target key end

     0   :  { %v689_v1 = vmov 0.0   ;;  %vm690_vm0 = vmmov 0   ;;  %vm60_vm1 = vcmask 261120   ;;  %s846_s0 = inlined_call_operand.vmem [shape: f32[8,32], index: 0, kind: input, shape index: {}]   ;;  %s847_s1 = inlined_call_operand.vmem [shape: f32[8,32], index: 1, kind: input, shape index: {}]   ;;  %s848_s2 = inlined_call_operand.vmem [shape: bf16[32,32], index: 2, kind: input, shape index: {}]   ;;  %s849_s3 = inlined_call_operand.vmem [shape: bf16[32,32], index: 3, kind: input, shape index: {}]   ;;  %s850_s4 = inlined_call_operand.vmem [shape: f32[1,32], index: 4, kind: input, shape index: {}]   ;;  %s851_s5 = inlined_call_operand.vmem [shape: bf16[4,32,32], index: 5, kind: input, shape index: {}]   ;;  %s852_s6 = inlined_call_operand.vmem [shape: f32[4,1,32], index: 6, kind: input, shape index: {}]   ;;  %s853_s7 = inlined_call_operand.vmem [shape: bf16[32,8], index: 7, kind: input, shape index: {}]   ;;  %s854_s8 = inlined_call_operand.vmem [shape: f32[1,8], index: 8, kind: input, shape index: {}]   ;;  %s855_s9 = inlined_call_operand.hbm [shape: f32[8,8], index: 9, kind: output, shape index: {}]  }
   0x1   :  { %v653_v0 = vld [vmem:[%s849_s3 + $0x8] sm:$0xff]   ;;  %594 = vmatprep.subr.bf16.mxu0 %v689_v1  ;;  %602 = vmatprep.subr.bf16.mxu1 %v689_v1  ;;  %v655_v3 = vld [vmem:[%s849_s3] sm:$0xff]  }
   0x2   :  { %v654_v2 = vld [vmem:[%s848_s2 + $0x8] sm:$0xff]   ;;  %595 = vmatpush3.bf16.msra.mxu0 %v653_v0  ;;  %598 = vmatprep.mubr.msk.bf16.mxu0 %vm690_vm0, %v689_v1  ;;  %v656_v4 = vld [vmem:[%s848_s2] sm:$0xff]  }
   0x3   :  { %603 = vmatpush3.bf16.msra.mxu1 %v654_v2  ;;  %596 = vmatprep.subr.bf16.mxu0 %v689_v1  ;;  %v37_v5 = vld [vmem:[%s847_s1] sm:$0xff] }
   0x4   :  { %604 = vmatprep.subr.bf16.mxu1 %v689_v1  ;;  %606 = vmatprep.mubr.msk.bf16.mxu1 %vm690_vm0, %v689_v1  ;;  %v34_v6 = vld [vmem:[%s846_s0] sm:$0xff]  ;;  %v38_v7 = vmax.f32 %v37_v5, 0.0 }
   0x5   :  { %v35_v8 = vmax.f32 %v34_v6, 0.0 }
   0x6   :  { %597 = vmatpush3.bf16.msra.mxu0 %v655_v3  ;;  %v39_v9 = vpack.c.bf16 %v38_v7, %v38_v7 }
   0x7   :  { %605 = vmatpush3.bf16.msra.mxu1 %v656_v4  ;;  %v36_v10 = vpack.c.bf16 %v35_v8, %v35_v8  ;;  %610 = vmatprep.subr.bf16.mxu0 %v689_v1 }
   0x8   :  { %618 = vmatprep.subr.bf16.mxu1 %v689_v1 }
   0x9   :  { %599 = vmatmul.mubr.msk.bf16.vlgmr.msra.gmra.mxu0 %vm60_vm1, %v39_v9 }
   0xa   :  { %607 = vmatmul.mubr.msk.bf16.vlgmr.msra.gmra.mxu1 %vm60_vm1, %v36_v10  ;;  %614 = vmatprep.mubr.msk.bf16.mxu0 %vm690_vm0, %v689_v1 }
   0xb   :  { %622 = vmatprep.mubr.msk.bf16.mxu1 %vm690_vm0, %v689_v1 }
   0xc   :  { %14 = vsyncpa [#allocation3], 0  ;;  %v657_v11 = vld [vmem:[%s851_s5 + $0x8] sm:$0xff]   ;;  %v658_v12 = vld [vmem:[%s851_s5] sm:$0xff]   ;;  %vm515_vm2 = vcmask 64512  }
   0xd   :  { %611 = vmatpush3.bf16.msra.mxu0 %v657_v11  ;;  %v659_v13 = vld [vmem:[%s851_s5 + $0x18] sm:$0xff]   ;;  %v537_v16 = vld [vmem:[%s850_s4] ss:$0 sm:$0xff]  ;;  %v660_v27 = vld [vmem:[%s851_s5 + $0x10] sm:$0xff]  }
   0xe   :  { %612 = vmatprep.subr.bf16.mxu0 %v689_v1  ;;  %619 = vmatpush3.bf16.msra.mxu1 %v659_v13  ;;  %v538_v28 = vld [vmem:[%s852_s6] ss:$0 sm:$0xff]  ;;  %v661_v36 = vld [vmem:[%s851_s5 + $0x28] sm:$0xff]   ;;  %v663_v38 = vld [vmem:[%s851_s5 + $0x38] sm:$0xff]  }
   0xf   :  { %620 = vmatprep.subr.bf16.mxu1 %v689_v1  ;;  %v662_v37 = vld [vmem:[%s851_s5 + $0x20] sm:$0xff]   ;;  %v664_v48 = vld [vmem:[%s851_s5 + $0x30] sm:$0xff]   ;;  %v665_v57 = vld [vmem:[%s853_s7 + $0x8] sm:$0xff]  }
  0x10   :  { %v547_v39 = vld [vmem:[%s852_s6 + $0x1] ss:$0 sm:$0xff]  ;;  %v556_v49 = vld [vmem:[%s852_s6 + $0x2] ss:$0 sm:$0xff]  ;;  %v565_v59 = vld [vmem:[%s852_s6 + $0x3] ss:$0 sm:$0xff] }
  0x11   :  { %613 = vmatpush3.bf16.msra.mxu0 %v658_v12  ;;  %v666_v58 = vld [vmem:[%s853_s7] sm:$0xff]   ;;  %s691_s7 = smov [#allocation2]  }
  0x12   :  { %626 = vmatprep.subr.bf16.mxu0 %v689_v1  ;;  %621 = vmatpush3.bf16.msra.mxu1 %v660_v27  ;;  %s523_s22 = sshll.u32 %s691_s7, 4  ;;  %s524_s22 = int_to_ptr.vmem [resolvable:$true] %s523_s22 }
  0x13   :  { %634 = vmatprep.subr.bf16.mxu1 %v689_v1  ;;  %s667_s6 = scalar_lea.vmem %s524_s22, 128  ;;  %p672_p1 = scmp.lt.s32.totalorder %s524_s22, %s524_s22 }
  0x14   :  { %p668_p0 = scmp.ne.s32.totalorder %s524_s22, %s667_s6  ;;  %p673_p2 = scmp.lt.s32.totalorder %s667_s6, %s667_s6 }
  0x16   :  { %p674_p3 = por %p673_p2, %p672_p1 }
  0x18   :  { %p675_p4 = pnand %p674_p3, %p668_p0 }
  0xc9   :  { %v98_v14 = vpop.f32.mrf.mxu0 }
  0xca   :  { %v153_v15 = vpop.f32.mrf.mxu1 }
  0xcb   :  { %v154_v17 = vadd.f32 %v153_v15, %v98_v14  ;;  %v600_v18 = vpop.f32.mrf.mxu0 }
  0xcc   :  { %v608_v19 = vpop.f32.mrf.mxu1 }
  0xcd   :  { %v166_v20 = vadd.f32 %v537_v16, %v154_v17  ;;  %v101_v21 = vpop.f32.mrf.mxu0 }
  0xce   :  { %v156_v22 = vpop.f32.mrf.mxu1 }
  0xcf   :  { %v167_v23 = vmax.f32 %v166_v20, 0.0  ;;  %v601_v24 = vpop.f32.mrf.mxu0 }
  0xd0   :  { %v609_v25 = vpop.f32.mrf.mxu1 }
  0xd1   :  { %v168_v26 = vpack.c.bf16 %v167_v23, %v167_v23 }
  0xd3   :  { %615 = vmatmul.mubr.msk.bf16.vlgmr.msra.gmra.mxu0 %vm60_vm1, %v168_v26 }
  0xd4   :  { %630 = vmatprep.mubr.msk.bf16.mxu0 %vm690_vm0, %v689_v1  ;;  %627 = vmatpush3.bf16.msra.mxu0 %v661_v36 }
  0xd5   :  { %628 = vmatprep.subr.bf16.mxu0 %v689_v1 }
  0xd8   :  { %629 = vmatpush3.bf16.msra.mxu0 %v662_v37 }
  0xd9   :  { %642 = vmatprep.subr.bf16.mxu0 %v689_v1 }
 0x193   :  { %v229_v29 = vpop.f32.mrf.mxu0 }
 0x194   :  { %v230_v30 = vadd.f32 %v538_v28, %v229_v29 }
 0x195   :  { %v616_v31 = vpop.f32.mrf.mxu0 }
 0x196   :  { %v235_v32 = vmax.f32 %v230_v30, 0.0 }
 0x197   :  { %v232_v33 = vpop.f32.mrf.mxu0 }
 0x198   :  { %v236_v34 = vpack.c.bf16 %v235_v32, %v235_v32 }
 0x199   :  { %v617_v35 = vpop.f32.mrf.mxu0 }
 0x19a   :  { %623 = vmatmul.mubr.msk.bf16.vlgmr.msra.gmra.mxu1 %vm60_vm1, %v236_v34 }
 0x19b   :  { %638 = vmatprep.mubr.msk.bf16.mxu1 %vm690_vm0, %v689_v1  ;;  %635 = vmatpush3.bf16.msra.mxu1 %v663_v38 }
 0x19c   :  { %636 = vmatprep.subr.bf16.mxu1 %v689_v1 }
 0x19f   :  { %637 = vmatpush3.bf16.msra.mxu1 %v664_v48 }
 0x25a   :  { %v299_v40 = vpop.f32.mrf.mxu1 }
 0x25b   :  { %v300_v41 = vadd.f32 %v547_v39, %v299_v40 }
 0x25c   :  { %v624_v42 = vpop.f32.mrf.mxu1 }
 0x25d   :  { %v305_v43 = vadd.f32 %v300_v41, %v166_v20 }
 0x25e   :  { %v302_v44 = vpop.f32.mrf.mxu1 }
 0x25f   :  { %v306_v45 = vmax.f32 %v305_v43, 0.0 }
 0x260   :  { %v625_v46 = vpop.f32.mrf.mxu1 }
 0x261   :  { %v307_v47 = vpack.c.bf16 %v306_v45, %v306_v45 }
 0x263   :  { %631 = vmatmul.mubr.msk.bf16.vlgmr.msra.gmra.mxu0 %vm60_vm1, %v307_v47 }
 0x264   :  { %646 = vmatprep.mubr.msk.bf16.mxu0 %vm690_vm0, %v689_v1  ;;  %643 = vmatpush3.bf16.msra.mxu0 %v665_v57 }
 0x265   :  { %644 = vmatprep.subr.bf16.mxu0 %v689_v1  ;;  %v569_v1 = vld [vmem:[%s854_s8] ss:$0 sm:$0xff] }
 0x268   :  { %645 = vmatpush3.bf16.msra.mxu0 %v666_v58 }
 0x323   :  { %v370_v50 = vpop.f32.mrf.mxu0 }
 0x324   :  { %v371_v51 = vadd.f32 %v556_v49, %v370_v50 }
 0x325   :  { %v632_v52 = vpop.f32.mrf.mxu0 }
 0x326   :  { %v376_v53 = vmax.f32 %v371_v51, 0.0 }
 0x327   :  { %v373_v54 = vpop.f32.mrf.mxu0 }
 0x328   :  { %v377_v55 = vpack.c.bf16 %v376_v53, %v376_v53 }
 0x329   :  { %v633_v56 = vpop.f32.mrf.mxu0 }
 0x32a   :  { %639 = vmatmul.mubr.msk.bf16.vlgmr.msra.gmra.mxu1 %vm60_vm1, %v377_v55 }
 0x3ea   :  { %v440_v60 = vpop.f32.mrf.mxu1 }
 0x3eb   :  { %v441_v61 = vadd.f32 %v565_v59, %v440_v60 }
 0x3ec   :  { %v640_v62 = vpop.f32.mrf.mxu1 }
 0x3ed   :  { %v446_v63 = vadd.f32 %v441_v61, %v305_v43 }
 0x3ee   :  { %v443_v0 = vpop.f32.mrf.mxu1 }
 0x3ef   :  { %v447_v2 = vmax.f32 %v446_v63, 0.0 }
 0x3f0   :  { %v641_v3 = vpop.f32.mrf.mxu1 }
 0x3f1   :  { %v448_v4 = vpack.c.bf16 %v447_v2, %v447_v2 }
 0x3f3   :  { %647 = vmatmul.mubr.msk.bf16.vlgmr.msra.gmra.mxu0 %vm60_vm1, %v448_v4 }
 0x4b3   :  { %v509_v5 = vpop.f32.mrf.mxu0 }
 0x4b4   :  { %v510_v6 = vadd.f32 %v569_v1, %v509_v5 }
 0x4b5   :  { %v648_v7 = vpop.f32.mrf.mxu0 }
 0x4b6   :  { %516 = vst.msk [vmem:[#allocation2] sm:$0xff] %vm515_vm2, %v510_v6 }
 0x4b7   :  { %v512_v8 = vpop.f32.mrf.mxu0 }
 0x4b8   :  { %678 = shalt.err (!%p675_p4)
}
 0x4b9   :  { %526 = dma.vmem_to_hbm [thread:$0]  %s524_s22, 128, %s855_s9, [#allocation3]   ;;  %v649_v9 = vpop.f32.mrf.mxu0 }
 0x4ba   :  { %687 = dma.done.wait [#allocation3], 128  }
 0x4bb   :  { %688 = vsyncadd [#allocation3], 4294967168 }
 0x4bc   :  { %530 = vsyncpa [#allocation3], 1 }

</bundles_post_ra>
